<compile_context>
chip_gen: v5e
topology: v5e:2x2
jax: 0.10.0
libtpu: 0.0.40
codegen_flags: <defaults>
</compile_context>

<pallas_src>
import functools

import jax
import jax.numpy as jnp
from jax import lax
from jax.experimental import pallas as pl
from jax.experimental.pallas import tpu as pltpu


# --------------------------------------------------------------------------
# helpers
# --------------------------------------------------------------------------
def _round_up(n, m):
    return ((n + m - 1) // m) * m


def _pad_last(a, target):
    pad = target - a.shape[-1]
    if pad == 0:
        return a
    return jnp.pad(a, [(0, 0)] * (a.ndim - 1) + [(0, pad)])


def _vmem_budget_bytes():
    """Per-TensorCore VMEM budget with ~25% headroom (generation aware)."""
    try:
        cap = pltpu.get_tpu_info().vmem_capacity_bytes
    except Exception:
        cap = 64 * 1024 * 1024      # v7x-sized lower bound; safe everywhere
    return int(cap * 0.75)          # ~48 MiB on v7x, ~96 MiB on v5e/v6e


def _attn_vmem_estimate(tq, tk, hp, out_itemsize):
    """Rough VMEM bytes for one flash-attention grid step."""
    bf16, f32 = 2, 4
    dma = 2 * tq * hp * bf16 + 2 * 2 * tk * hp * bf16   # dbl-buffered Q + K,V
    out = 2 * tq * hp * out_itemsize                     # dbl-buffered output
    scratch = tq * hp * f32 + 2 * tq * f32               # acc + m + l
    temps = 3 * tq * tk * f32                            # s, p (+ headroom)
    return dma + out + scratch + temps


def _pick_seq_tile(vmem_budget, hp, out_itemsize):
    # 256-aligned tiles fill the 256x256 MXU on v6e/v7x; 512 also amortizes
    # the ~0.35us per-grid-step overhead.  Shrink only if VMEM is tight.
    for cand in (512, 256, 128):
        if _attn_vmem_estimate(cand, cand, hp, out_itemsize) <= vmem_budget // 2:
            return cand
    return 128


# --------------------------------------------------------------------------
# Stage 1: fused Q|K|V projection (once per token)
# --------------------------------------------------------------------------
def _qkv_proj_kernel(x_ref, w_ref, b_ref, q_ref, k_ref, v_ref, *, hp, scale):
    """x_ref: (1, ts, D_in)  f32 input tile (cast to bf16 for the MXU)
    w_ref : (D_in, 3*hp)     fused zero-padded [Wq|Wk|Wv], bf16, whole in VMEM
    b_ref : (1, 3*hp)        fused zero-padded bias, f32, whole in VMEM
    q/k/v_ref: (1, ts, hp)   bf16 outputs; Q already carries 1/sqrt(H) scale.
    """
    x = x_ref[0].astype(jnp.bfloat16)                       # (ts, D_in)
    qkv = jnp.dot(x, w_ref[...], preferred_element_type=jnp.float32)
    qkv = qkv + b_ref[...]                                  # f32 (ts, 3*hp)
    q_ref[0] = (qkv[:, :hp] * scale).astype(q_ref.dtype)    # scale folded once
    k_ref[0] = qkv[:, hp:2 * hp].astype(k_ref.dtype)
    v_ref[0] = qkv[:, 2 * hp:].astype(v_ref.dtype)


# --------------------------------------------------------------------------
# Stage 2: flash attention (online softmax)
# --------------------------------------------------------------------------
def _flash_attn_kernel(q_ref, k_ref, v_ref, o_ref, m_scr, l_scr, acc_scr,
                       *, seq_len, kv_tile, masked):
    ki = pl.program_id(2)
    nk = pl.num_programs(2)

    @pl.when(ki == 0)
    def _init():
        m_scr[...] = jnp.full_like(m_scr, -jnp.inf)
        l_scr[...] = jnp.zeros_like(l_scr)
        acc_scr[...] = jnp.zeros_like(acc_scr)

    q = q_ref[0]                                   # (tq, hp) bf16, pre-scaled
    k = k_ref[0]                                   # (tk, hp) bf16
    v = v_ref[0]                                   # (tk, hp) bf16

    # Scores: contract last dims directly (no explicit K transpose); bf16
    # operands, f32 accumulation.
    s = lax.dot_general(q, k, (((1,), (1,)), ((), ())),
                        preferred_element_type=jnp.float32)    # (tq, tk) f32

    if masked:
        # Mask padded kv columns.  S_pad = round_up(S, tk), so every kv tile
        # has >= 1 valid column and m_new below is always finite (no NaN in
        # exp(m_prev - m_new)).
        col = ki * kv_tile + lax.broadcasted_iota(jnp.int32, s.shape, 1)
        s = jnp.where(col < seq_len, s, -jnp.inf)

    # Online softmax update (state kept in f32; exp in f32 is v5e-safe).
    m_prev = m_scr[...]
    m_new = jnp.maximum(m_prev, jnp.max(s, axis=-1, keepdims=True))
    alpha = jnp.exp(m_prev - m_new)                # 0 on the first step (-inf)
    p = jnp.exp(s - m_new)                         # (tq, tk) f32
    # (Optional further opt: fuse this row-sum into the P·V matmul by
    #  appending a ones column to V if the XLU ever becomes the binder.)
    l_scr[...] = alpha * l_scr[...] + jnp.sum(p, axis=-1, keepdims=True)
    acc_scr[...] = alpha * acc_scr[...] + jnp.dot(
        p.astype(jnp.bfloat16), v, preferred_element_type=jnp.float32)
    m_scr[...] = m_new

    @pl.when(ki == nk - 1)
    def _fin():
        # Exact reciprocal: runs once per (batch, q-tile), approx buys nothing.
        inv_l = pl.reciprocal(l_scr[...], approx=False)
        o_ref[0] = (acc_scr[...] * inv_l).astype(o_ref.dtype)


# --------------------------------------------------------------------------
# wrapper
# --------------------------------------------------------------------------
def attention_block(x, wq, wk, wv, bq, bk, bv):
    """x: (B, S, D_in); w*: (D_in, H); b*: (1, H)  ->  (B, S, H)."""
    B, S, D_in = x.shape
    H = wq.shape[1]
    out_dtype = x.dtype

    # Lane-dense hidden slab: pad H up to (at least) 128 lanes with zero
    # columns.  Zero Q/K columns leave Q.K^T unchanged; zero V columns are
    # sliced off below, so the math equals the unpadded module.
    Hp = _round_up(max(H, 128), 128)

    vmem_budget = _vmem_budget_bytes()

    # Sequence tiling: fixed tile + wrapper-side zero padding + in-kernel
    # masking of padded kv columns keeps VMEM O(tile^2) for any S (no S^2
    # full-sequence fallback).
    tile = _pick_seq_tile(vmem_budget, Hp, jnp.dtype(out_dtype).itemsize)
    if S >= tile:
        S_pad = _round_up(S, tile)
        tq = tk = tile
    else:
        S_pad = _round_up(S, 8)        # sublane-aligned single tile
        tq = tk = S_pad
    masked = (S_pad != S)

    x_p = x if S_pad == S else jnp.pad(x, ((0, 0), (0, S_pad - S), (0, 0)))

    # Fused, padded projection parameters: [Wq|Wk|Wv] -> (D_in, 3*Hp).
    # Weights are bf16 (MXU operand dtype, half the DMA bytes); bias stays f32
    # and is added post-matmul.
    w_fused = jnp.concatenate(
        [_pad_last(wq, Hp), _pad_last(wk, Hp), _pad_last(wv, Hp)],
        axis=-1).astype(jnp.bfloat16)
    b_fused = jnp.concatenate(
        [_pad_last(bq, Hp), _pad_last(bk, Hp), _pad_last(bv, Hp)],
        axis=-1).astype(jnp.float32)

    # ---- Stage 1: project Q/K/V once per token (no per-q-tile redundancy) --
    ns = S_pad // tq
    scale = 1.0 / (float(H) ** 0.5)           # PyTorch: / Q.shape[-1] ** 0.5
    qkv_shape = jax.ShapeDtypeStruct((B, S_pad, Hp), jnp.bfloat16)
    q_p, k_p, v_p = pl.pallas_call(
        functools.partial(_qkv_proj_kernel, hp=Hp, scale=scale),
        out_shape=(qkv_shape, qkv_shape, qkv_shape),
        grid=(B, ns),
        in_specs=[
            pl.BlockSpec((1, tq, D_in), lambda b, si: (b, si, 0)),
            # Grid-invariant weight/bias: whole array resident in VMEM, a
            # single copy (no double-buffering of an unchanging block).
            pl.BlockSpec(memory_space=pltpu.MemorySpace.VMEM),
            pl.BlockSpec(memory_space=pltpu.MemorySpace.VMEM),
        ],
        out_specs=[
            pl.BlockSpec((1, tq, Hp), lambda b, si: (b, si, 0)),
            pl.BlockSpec((1, tq, Hp), lambda b, si: (b, si, 0)),
            pl.BlockSpec((1, tq, Hp), lambda b, si: (b, si, 0)),
        ],
        compiler_params=pltpu.CompilerParams(
            dimension_semantics=("parallel", "parallel"),
            vmem_limit_bytes=vmem_budget),
    )(x_p, w_fused, b_fused)

    # ---- Stage 2: flash attention with online softmax ----
    nq, nk = S_pad // tq, S_pad // tk
    out_padded = pl.pallas_call(
        functools.partial(_flash_attn_kernel, seq_len=S, kv_tile=tk,
                          masked=masked),
        out_shape=jax.ShapeDtypeStruct((B, S_pad, Hp), out_dtype),
        grid=(B, nq, nk),
        in_specs=[
            pl.BlockSpec((1, tq, Hp), lambda b, qi, ki: (b, qi, 0)),   # Q
            pl.BlockSpec((1, tk, Hp), lambda b, qi, ki: (b, ki, 0)),   # K
            pl.BlockSpec((1, tk, Hp), lambda b, qi, ki: (b, ki, 0)),   # V
        ],
        out_specs=pl.BlockSpec((1, tq, Hp), lambda b, qi, ki: (b, qi, 0)),
        scratch_shapes=[
            pltpu.VMEM((tq, 1), jnp.float32),    # running max
            pltpu.VMEM((tq, 1), jnp.float32),    # running denominator
            pltpu.VMEM((tq, Hp), jnp.float32),   # output accumulator
        ],
        compiler_params=pltpu.CompilerParams(
            dimension_semantics=("parallel", "parallel", "arbitrary"),
            vmem_limit_bytes=vmem_budget),
    )(q_p, k_p, v_p)

    return out_padded[:, :S, :H]


def attention_block_ref(x, wq, wk, wv, bq, bk, bv):
    q = x @ wq + bq
    k = x @ wk + bk
    v = x @ wv + bv
    scores = jnp.einsum("bqd,bkd->bqk", q, k) / (q.shape[-1] ** 0.5)
    w = jax.nn.softmax(scores, axis=-1)
    return jnp.einsum("bqk,bkd->bqd", w, v)


if __name__ == "__main__":
    B, S, D_IN, HIDDEN = 2, 8, 32, 32

    key = jax.random.PRNGKey(0)
    kx, kq, kk, kv, kbq, kbk, kbv = jax.random.split(key, 7)

    x = jax.random.normal(kx, (B, S, D_IN), dtype=jnp.float32)

    # Deterministic parameter init (mimics nn.Linear uniform init range).
    bound = 1.0 / (D_IN ** 0.5)
    wq = jax.random.uniform(kq, (D_IN, HIDDEN), jnp.float32, -bound, bound)
    wk = jax.random.uniform(kk, (D_IN, HIDDEN), jnp.float32, -bound, bound)
    wv = jax.random.uniform(kv, (D_IN, HIDDEN), jnp.float32, -bound, bound)
    bq = jax.random.uniform(kbq, (1, HIDDEN), jnp.float32, -bound, bound)
    bk = jax.random.uniform(kbk, (1, HIDDEN), jnp.float32, -bound, bound)
    bv = jax.random.uniform(kbv, (1, HIDDEN), jnp.float32, -bound, bound)

    out = attention_block(x, wq, wk, wv, bq, bk, bv)
    out = jax.block_until_ready(out)

    ref = attention_block_ref(x, wq, wk, wv, bq, bk, bv)
    assert out.shape == (B, S, HIDDEN)
    # Tolerance reflects bf16 MXU operands (per perf review) with f32
    # accumulation and f32 softmax state; observed error is a few 1e-3.
    assert jnp.allclose(out, ref, atol=2e-2, rtol=2e-2), "mismatch vs reference"

    print("KERNEL_OK")
</pallas_src>

<mosaic_0001>
module attributes {stable_mosaic.version = 11 : i64} {
  func.func @_qkv_proj_kernel(%arg0: i32, %arg1: i32, %arg2: memref<1x8x32xf32, #tpu.memory_space<vmem>>, %arg3: memref<32x384xbf16, #tpu.memory_space<vmem>>, %arg4: memref<1x384xf32, #tpu.memory_space<vmem>>, %arg5: memref<1x8x128xbf16, #tpu.memory_space<vmem>>, %arg6: memref<1x8x128xbf16, #tpu.memory_space<vmem>>, %arg7: memref<1x8x128xbf16, #tpu.memory_space<vmem>>) attributes {dimension_semantics = [#tpu.dimension_semantics<parallel>, #tpu.dimension_semantics<parallel>], iteration_bounds = array<i64: 2, 1>, scalar_prefetch = 0 : i64, scratch_operands = 0 : i64, tpu.core_type = #tpu.core_type<tc>, window_params = [{transform_indices = @transform_0, window_bounds = array<i64: 1, 8, 32>}, {pipeline_mode = #tpu.pipeline_mode<synchronous>, transform_indices = @transform_1, window_bounds = array<i64: 32, 384>}, {pipeline_mode = #tpu.pipeline_mode<synchronous>, transform_indices = @transform_2, window_bounds = array<i64: 1, 384>}, {transform_indices = @transform_3, window_bounds = array<i64: 1, 8, 128>}, {transform_indices = @transform_4, window_bounds = array<i64: 1, 8, 128>}, {transform_indices = @transform_5, window_bounds = array<i64: 1, 8, 128>}]} {
    %c0 = arith.constant 0 : index
    %c0_0 = arith.constant 0 : index
    %c0_1 = arith.constant 0 : index
    %0 = vector.load %arg2[%c0, %c0_0, %c0_1] : memref<1x8x32xf32, #tpu.memory_space<vmem>>, vector<1x8x32xf32>
    %1 = vector.shape_cast %0 : vector<1x8x32xf32> to vector<8x32xf32>
    %2 = arith.truncf %1 : vector<8x32xf32> to vector<8x32xbf16>
    %c0_2 = arith.constant 0 : index
    %c0_3 = arith.constant 0 : index
    %3 = vector.load %arg3[%c0_2, %c0_3] : memref<32x384xbf16, #tpu.memory_space<vmem>>, vector<32x384xbf16>
    %cst = arith.constant dense<0.000000e+00> : vector<8x384xf32>
    %4 = tpu.matmul %2, %3, %cst {dimension_numbers = #tpu.dot_dimension_numbers<[1], [0], [0], [1], [0, 0, 1, 1], [], []>} : vector<8x32xbf16>, vector<32x384xbf16>, vector<8x384xf32> -> vector<8x384xf32>
    %c0_4 = arith.constant 0 : index
    %c0_5 = arith.constant 0 : index
    %5 = vector.load %arg4[%c0_4, %c0_5] : memref<1x384xf32, #tpu.memory_space<vmem>>, vector<1x384xf32>
    %6 = vector.broadcast %5 : vector<1x384xf32> to vector<8x384xf32>
    %7 = arith.addf %4, %6 : vector<8x384xf32>
    %8 = vector.extract_strided_slice %7 {offsets = [0, 0], sizes = [8, 128], strides = [1, 1]} : vector<8x384xf32> to vector<8x128xf32>
    %cst_6 = arith.constant 0.176776692 : f32
    %9 = vector.broadcast %cst_6 : f32 to vector<8x128xf32>
    %10 = arith.mulf %8, %9 : vector<8x128xf32>
    %11 = arith.truncf %10 : vector<8x128xf32> to vector<8x128xbf16>
    %c0_7 = arith.constant 0 : index
    %c0_8 = arith.constant 0 : index
    %c0_9 = arith.constant 0 : index
    %12 = vector.load %arg5[%c0_7, %c0_8, %c0_9] : memref<1x8x128xbf16, #tpu.memory_space<vmem>>, vector<1x8x128xbf16>
    %13 = vector.shape_cast %12 : vector<1x8x128xbf16> to vector<8x128xbf16>
    %14 = vector.shape_cast %11 : vector<8x128xbf16> to vector<1x8x128xbf16>
    tpu.vector_store %arg5[%c0_7, %c0_8, %c0_9], %14 {strides = array<i32>} : memref<1x8x128xbf16, #tpu.memory_space<vmem>>, vector<1x8x128xbf16>,
    %15 = vector.extract_strided_slice %7 {offsets = [0, 128], sizes = [8, 128], strides = [1, 1]} : vector<8x384xf32> to vector<8x128xf32>
    %16 = arith.truncf %15 : vector<8x128xf32> to vector<8x128xbf16>
    %c0_10 = arith.constant 0 : index
    %c0_11 = arith.constant 0 : index
    %c0_12 = arith.constant 0 : index
    %17 = vector.load %arg6[%c0_10, %c0_11, %c0_12] : memref<1x8x128xbf16, #tpu.memory_space<vmem>>, vector<1x8x128xbf16>
    %18 = vector.shape_cast %17 : vector<1x8x128xbf16> to vector<8x128xbf16>
    %19 = vector.shape_cast %16 : vector<8x128xbf16> to vector<1x8x128xbf16>
    tpu.vector_store %arg6[%c0_10, %c0_11, %c0_12], %19 {strides = array<i32>} : memref<1x8x128xbf16, #tpu.memory_space<vmem>>, vector<1x8x128xbf16>,
    %20 = vector.extract_strided_slice %7 {offsets = [0, 256], sizes = [8, 128], strides = [1, 1]} : vector<8x384xf32> to vector<8x128xf32>
    %21 = arith.truncf %20 : vector<8x128xf32> to vector<8x128xbf16>
    %c0_13 = arith.constant 0 : index
    %c0_14 = arith.constant 0 : index
    %c0_15 = arith.constant 0 : index
    %22 = vector.load %arg7[%c0_13, %c0_14, %c0_15] : memref<1x8x128xbf16, #tpu.memory_space<vmem>>, vector<1x8x128xbf16>
    %23 = vector.shape_cast %22 : vector<1x8x128xbf16> to vector<8x128xbf16>
    %24 = vector.shape_cast %21 : vector<8x128xbf16> to vector<1x8x128xbf16>
    tpu.vector_store %arg7[%c0_13, %c0_14, %c0_15], %24 {strides = array<i32>} : memref<1x8x128xbf16, #tpu.memory_space<vmem>>, vector<1x8x128xbf16>,
    return
  }
  func.func @transform_0(%arg0: i32, %arg1: i32) -> (i32, i32, i32) {
    %c0_i32 = arith.constant 0 : i32
    %c0_i32_0 = arith.constant 0 : i32
    return %arg0, %arg1, %c0_i32 : i32, i32, i32
  }
  func.func @transform_1(%arg0: i32, %arg1: i32) -> (i32, i32) {
    %c0_i32 = arith.constant 0 : i32
    %c0_i32_0 = arith.constant 0 : i32
    %c0_i32_1 = arith.constant 0 : i32
    return %c0_i32, %c0_i32_0 : i32, i32
  }
  func.func @transform_2(%arg0: i32, %arg1: i32) -> (i32, i32) {
    %c0_i32 = arith.constant 0 : i32
    %c0_i32_0 = arith.constant 0 : i32
    %c0_i32_1 = arith.constant 0 : i32
    return %c0_i32, %c0_i32_0 : i32, i32
  }
  func.func @transform_3(%arg0: i32, %arg1: i32) -> (i32, i32, i32) {
    %c0_i32 = arith.constant 0 : i32
    %c0_i32_0 = arith.constant 0 : i32
    return %arg0, %arg1, %c0_i32 : i32, i32, i32
  }
  func.func @transform_4(%arg0: i32, %arg1: i32) -> (i32, i32, i32) {
    %c0_i32 = arith.constant 0 : i32
    %c0_i32_0 = arith.constant 0 : i32
    return %arg0, %arg1, %c0_i32 : i32, i32, i32
  }
  func.func @transform_5(%arg0: i32, %arg1: i32) -> (i32, i32, i32) {
    %c0_i32 = arith.constant 0 : i32
    %c0_i32_0 = arith.constant 0 : i32
    return %arg0, %arg1, %c0_i32 : i32, i32, i32
  }
}

</mosaic_0001>

<bundles_post_ra>
// kernel: tpu_custom_call.1
= control target key start
LH: loop header
LB: loop body
LE: loop exit
PB: predicated region body
PF: predicated region fallthrough
CT: control target
= control target key end

     0   :  { %s1270_s0 = inlined_call_operand.hbm [shape: f32[2,8,32], index: 0, kind: input, shape index: {}]   ;;  %s1271_s1 = inlined_call_operand.hbm [shape: bf16[32,384], index: 1, kind: input, shape index: {}]   ;;  %s1272_s2 = inlined_call_operand.hbm [shape: f32[1,384], index: 2, kind: input, shape index: {}]   ;;  %s1273_s3 = inlined_call_operand.hbm [shape: bf16[2,8,128], index: 3, kind: output, shape index: {0}]   ;;  %s1274_s4 = inlined_call_operand.hbm [shape: bf16[2,8,128], index: 4, kind: output, shape index: {1}]   ;;  %s1275_s5 = inlined_call_operand.hbm [shape: bf16[2,8,128], index: 5, kind: output, shape index: {2}]  }
   0x1   :  { %1282 = sst [smem:[#allocation18_spill]] %s1270_s0 }
   0x2   :  { %1283 = sst [smem:[#allocation19_spill]] %s1271_s1 }
   0x3   :  { %11 = vsyncpa [#allocation3], 0 }
   0x4   :  { %13 = vsyncpa [#allocation3 + $0x1], 0 }
   0x5   :  { %14 = vsyncpa [#allocation6], 0 }
   0x6   :  { %15 = vsyncpa [#allocation4], 0 }
   0x7   :  { %17 = vsyncpa [#allocation4 + $0x1], 0 }
   0x8   :  { %18 = vsyncpa [#allocation10], 0 }
   0x9   :  { %20 = vsyncpa [#allocation10 + $0x1], 0  ;;  %s1057_s18 = smov 0   ;;  %s1059_s19 = smov 0  }
   0xa   :  { %s1061_s20 = smov 0   ;;  %s1063_s21 = smov 0  }
   0xb   :  { %s1065_s22 = smov 0   ;;  %s1067_s23 = smov 0  }
   0xc LB: > { %s1088_s24 = sadd.s32 4294967295, %s1021_s23   ;;  %p636_p0 = scmp.ge.s32.totalorder %s1021_s23, 1  ;;  %s1021_s23 = sphi %s1067_s23, %s26_s23   ;;  %s1017_s22 = sphi %s1065_s22, %s1304_s22   ;;  %s1013_s21 = sphi %s1063_s21, %s1303_s21   ;;  %s1009_s20 = sphi %s1061_s20, %s1302_s20   ;;  %s1005_s19 = sphi %s1059_s19, %s1301_s19   ;;  %s1001_s18 = sphi %s1057_s18, %s1300_s18  }
   0xd   : > { %p61_p1 = scmp.eq.s32.totalorder %s1088_s24, 0  ;;  %p197_p2 = scmp.lt.s32.totalorder %s1021_s23, 3 }
   0xe   : > { %s1284_s1 = sld [smem:[#allocation19_spill]]  ;;  %s1023_s29 = smov [#allocation5]  }
   0xf   : > { %p1096_p3 = pnand %p636_p0, %p197_p2  ;;  %s210_s30 = sshll.u32 %s1023_s29, 4  ;;  %s211_s30 = int_to_ptr.vmem [resolvable:$true] %s210_s30 }
  0x10   : > { %p639_p6 = scmp.ge.s32.totalorder %s1021_s23, 2  ;;  %s223_s8 = sshll.u32 %s1272_s2, 4  ;;  %s224_s8 = int_to_ptr.hbm [resolvable:$true] %s223_s8 }
  0x11   : > { %p706_p4 = pneg %p1096_p3  ;;  %s1024_s9 = smov 192  }
  0x12   : > { %s1025_s10 = smov 12   ;;  %s1026_s11 = smov [#allocation7]  }
  0x13   : > { %p707_p5 = pnand %p706_p4, %p61_p1  ;;  %s225_s12 = sshll.u32 %s1026_s11, 4  ;;  %s226_s12 = int_to_ptr.vmem [resolvable:$true] %s225_s12 }
  0x14   : > { %s208_s27 = sshll.u32 %s1284_s1, 4  ;;  %s38_s13 = sadd.s32 1, %s1017_s22  ;;  %s209_s27 = int_to_ptr.hbm [resolvable:$true] %s208_s27 }
  0x15   : > { %709 = dma.hbm_to_vmem [thread:$0]  (!%p707_p5), %s209_s27, 768, %s211_s30, [#allocation6], %s1024_s9, %s1024_s9, %s1025_s10  }
  0x16   : > { %712 = dma.hbm_to_vmem [thread:$0]  (!%p707_p5), %s224_s8, 48, %s226_s12, [#allocation6]  }
  0x17   : > { %s1276_s14 = sadd.s32 4294967294, %s1021_s23   ;;  %p40_p7 = scmp.ge.s32.totalorder %s38_s13, 2 }
  0x18   : > { %s47_s15 = sadd.s32 1, %s1009_s20  ;;  %p54_p8 = scmp.ne.s32.totalorder %s1009_s20, %s1005_s19 }
  0x19   : > { %s1306_s13 = smov (%p40_p7, %s38_s13), 0  ;;  %p55_p9 = scmp.eq.s32.totalorder %s1021_s23, 0 }
  0x1a   : > { %p60_p10 = scmp.ne.s32.totalorder %s1005_s19, %s1001_s18  ;;  %s42_s16 = ssub.s32 %s1017_s22, %s1306_s13 }
  0x1b   : > { %p128_p11 = scmp.eq.s32.totalorder %s1088_s24, 1  ;;  %p45_p12 = scmp.eq.s32.totalorder %s42_s16, 0 }
  0x1c   : > { %p1123_p13 = por %p61_p1, %p60_p10  ;;  %p134_p2 = scmp.eq.s32.totalorder %s1276_s14, 1 }
  0x1d   : > { %p1127_p0 = por %p128_p11, %p54_p8  ;;  %p56_p4 = por %p55_p9, %p54_p8 }
  0x1e   : > { %s1134_s26 = scalar_select %p45_p12, %s1009_s20, %s47_s15  }
  0x1f   : > { %p1136_p5 = por %p134_p2, %p60_p10  ;;  %s236_s29 = sand.u32 1, %s1009_s20  }
  0x20   : > { %s641_s30 = sshll.u32 %s1017_s22, 3  ;;  %p729_p7 = scmp.lt.s32.totalorder %s1021_s23, 2 }
  0x21   : > { %s640_s6 = sshll.u32 %s236_s29, 3  ;;  %s1289_s0 = sld [smem:[#allocation18_spill]] }
  0x22   : > { %s240_s11 = scalar_lea.vmem [#allocation2], %s640_s6  ;;  %p714_p11 = pnand %p729_p7, %p56_p4 }
  0x23   : > { %s249_s12 = sshll.u32 %s240_s11, 4  ;;  %s237_s15 = scalar_lea.sflag [#allocation3], %s236_s29  ;;  %s250_s12 = int_to_ptr.vmem [resolvable:$true] %s249_s12 }
  0x25   : > { %258 = sbr.rel (%p1096_p3) target bundleno = 229 (0xe5), region = 32 }
  0x27   : > { %s245_s9 = scalar_lea.hbm %s1289_s0, %s641_s30 }
  0x28   : > { %s247_s10 = sshll.u32 %s245_s9, 4  ;;  %s248_s10 = int_to_ptr.hbm [resolvable:$true] %s247_s10 }
  0x29   : > { %716 = dma.hbm_to_vmem [thread:$0]  (!%p714_p11), %s248_s10, 128, %s250_s12, %s237_s15  }
  0x2a   : > { %s1149_s16 = sand.u32 1, %s1005_s19  }
  0x2b   : > { %s643_s14 = sshll.u32 %s1149_s16, 3  ;;  %s261_s7 = scalar_lea.sflag [#allocation3], %s1149_s16 }
  0x2c   : > { %s264_s30 = scalar_lea.vmem [#allocation2], %s643_s14 }
  0x2d   : > { %984 = dma.done.wait (%p1123_p13), %s261_s7, 128  }
  0x2e   : > { %986 = vsyncadd (%p1123_p13), %s261_s7, 4294967168 }
  0x2f   : > { %988 = dma.done.wait (%p61_p1), [#allocation6], 816  }
  0x30   : > { %990 = vsyncadd (%p61_p1), [#allocation6], 4294966480  ;;  %v663_v0 = vld [vmem:[#allocation5 + $0x18] sm:$0xf]  ;;  %v688_v1 = vld [vmem:[#allocation5 + $0x20] sm:$0xf0] }
  0x31   : > { %v687_v2 = vld [vmem:[#allocation5 + $0x1c] sm:$0xf]  ;;  %v664_v3 = vor.u32 %v688_v1, %v663_v0  ;;  %v665_v4 = vld [vmem:[#allocation5 + $0x24] sm:$0xf0]  ;;  %v671_v5 = vld [vmem:[#allocation5 + $0x20] sm:$0xf] }
  0x32   : > { %v689_v6 = vld [vmem:[#allocation5 + $0x28] sm:$0xf0]  ;;  %v668_v7 = vor.u32 %v687_v2, %v665_v4  ;;  %v651_v9 = vld [vmem:[#allocation5] sm:$0xf]  ;;  %v684_v11 = vld [vmem:[#allocation5 + $0x4] sm:$0xf] }
  0x33   : > { %v672_v8 = vor.u32 %v689_v6, %v671_v5  ;;  %v685_v10 = vld [vmem:[#allocation5 + $0x8] sm:$0xf0]  ;;  %373 = vmatpush.bf16.msra.mxu0 %v664_v3  ;;  %v653_v13 = vld [vmem:[#allocation5 + $0xc] sm:$0xf0]  ;;  %v659_v14 = vld [vmem:[#allocation5 + $0x8] sm:$0xf] }
  0x34   : > { %v652_v12 = vor.u32 %v685_v10, %v651_v9  ;;  %v686_v15 = vld [vmem:[#allocation5 + $0x10] sm:$0xf0]  ;;  %386 = vmatpush.bf16.msra.mxu1 %v668_v7  ;;  %v656_v16 = vor.u32 %v684_v11, %v653_v13  ;;  %vm363_vm0 = vcmask 261120   ;;  %v323_v20 = vld [vmem:[#allocation7] sm:$0x7]  ;;  %s1162_s28 = sshll.u32 %s1149_s16, 2 }
  0x35   : > { %399 = vmatpush.bf16.msra.mxu2 %v672_v8  ;;  %v660_v17 = vor.u32 %v686_v15, %v659_v14  ;;  %v313_v18 = vld [vmem:[%s264_s30] sm:$0xff]  ;;  %s679_s14 = sshll.u32 %s1013_s21, 2  ;;  %v325_v21 = vperm.slane %v323_v20, 0  ;;  %v326_v22 = vperm.slane %v323_v20, 1  ;;  %s418_s17 = sand.u32 1, %s1088_s24   ;;  %v327_v29 = vperm.slane %v323_v20, 2 }
  0x36   : > { %v314_v19 = vpack.c.bf16 %v313_v18, %v313_v18  ;;  %s450_s8 = scalar_lea.hbm %s1274_s4, %s679_s14  ;;  %s435_s11 = scalar_lea.hbm %s1273_s3, %s679_s14 }
  0x37   : > { %374 = vmatpush.bf16.msra.mxu0 %v652_v12  ;;  %s304_s12 = scalar_lea.vmem [#allocation9], %s1162_s28  ;;  %s1175_s21 = sshll.u32 %s450_s8, 4  ;;  %s455_s21 = int_to_ptr.hbm [resolvable:$true] %s1175_s21 }
  0x38   : > { %387 = vmatpush.bf16.msra.mxu1 %v656_v16  ;;  %s1173_s15 = sshll.u32 %s304_s12, 4  ;;  %s1277_s24 = scalar_lea.vmem [#allocation8], %s1162_s28  ;;  %s453_s15 = int_to_ptr.vmem [resolvable:$true] %s1173_s15 }
  0x39   : > { %400 = vmatpush.bf16.msra.mxu2 %v660_v17  ;;  %s1180_s7 = sshll.u32 %s1277_s24, 4  ;;  %s1182_s30 = sshll.u32 %s435_s11, 4 }
  0x3a   : > { %673 = vmatmul.msk.bf16.vlgmr.msra.gmra.mxu0 %vm363_vm0, %v314_v19  ;;  %1290 = sst [smem:[#allocation16_spill]] %s1180_s7  ;;  %s465_s9 = scalar_lea.hbm %s1275_s5, %s679_s14 }
  0x3b   : > { %674 = vmatmul.msk.bf16.vlgmr.msra.gmra.mxu1 %vm363_vm0, %v314_v19  ;;  %1291 = sst [smem:[#allocation17_spill]] %s1182_s30  ;;  %s1281_s8 = scalar_lea.vmem [#allocation11], %s1162_s28 }
  0x3c   : > { %675 = vmatmul.msk.bf16.vlgmr.msra.gmra.mxu2 %vm363_vm0, %v314_v19  ;;  %s1194_s10 = sshll.u32 %s1281_s8, 4  ;;  %s1196_s11 = sshll.u32 %s465_s9, 4  ;;  %s468_s10 = int_to_ptr.vmem [resolvable:$true] %s1194_s10  ;;  %s470_s11 = int_to_ptr.hbm [resolvable:$true] %s1196_s11 }
  0x3d   : > { %s1198_s24 = scalar_lea.sflag [#allocation10], %s418_s17  ;;  %s889_s0 = sshra.s32 %s455_s21, 4  ;;  %s890_s0 = int_to_ptr.hbm [resolvable:$true] %s889_s0 }
  0x3e   : > { %s891_s14 = scalar_lea.hbm %s890_s0, 4  ;;  %p896_p9 = scmp.lt.s32.totalorder %s890_s0, %s1274_s4 }
  0x3f   : > { %p892_p1 = scmp.ne.s32.totalorder %s890_s0, %s891_s14 }
  0x41   : > { %p893_p3 = pnand %p892_p1, %p1127_p0 }
  0x43   : > { %p894_p8 = pneg %p893_p3 }
  0xb7   : > { %v376_v23 = vpop.f32.mrf.mxu0 }
  0xb8   : > { %v377_v24 = vadd.f32 %v376_v23, %v325_v21  ;;  %v389_v25 = vpop.f32.mrf.mxu1 }
  0xb9   : > { %v390_v26 = vadd.f32 %v389_v25, %v326_v22 }
  0xba   : > { %v406_v27 = vmul.f32 0.17677669, %v377_v24 }
  0xbb   : > { %v409_v28 = vpack.c.bf16 %v390_v26, %v390_v26 }
  0xbc   : > { %v407_v30 = vpack.c.bf16 %v406_v27, %v406_v27 }
  0xbd   : > { %410 = vst [vmem:[%s304_s12] sm:$0xf] %v409_v28  ;;  %s895_s12 = scalar_lea.hbm %s1274_s4, 8 }
  0xbe   : > { %p897_p10 = scmp.lt.s32.totalorder %s895_s12, %s891_s14 }
  0xbf   : > { %v402_v31 = vpop.f32.mrf.mxu2 }
  0xc0   : > { %p898_p12 = por %p897_p10, %p896_p9 }
  0xc2   : > { %p899_p13 = pnand %p898_p12, %p894_p8 }
  0xc4   : > { %902 = shalt.err (!%p899_p13)
}
  0xc5   : > { %s1292_s17 = sld [smem:[#allocation17_spill]]  ;;  %s1293_s9 = scalar_lea.vmem [#allocation8], %s1162_s28  ;;  %v403_v32 = vadd.f32 %v402_v31, %v327_v29  ;;  %v378_v33 = vpop.f32.mrf.mxu0 }
  0xc6   : > { %701 = dma.vmem_to_hbm [thread:$0]  (%p1127_p0), %s453_s15, 64, %s455_s21, %s1198_s24   ;;  %408 = vst [vmem:[%s1293_s9] sm:$0xf] %v407_v30 }
  0xc7   : > { %s414_s29 = scalar_lea.sflag [#allocation4], %s1149_s16  ;;  %s923_s12 = scalar_lea.hbm %s1273_s3, 8 }
  0xcb   : > { %s1294_s6 = int_to_ptr.hbm [resolvable:$true] %s1292_s17 }
  0xcc   : > { %s917_s7 = sshra.s32 %s1294_s6, 4  ;;  %s918_s7 = int_to_ptr.hbm [resolvable:$true] %s917_s7 }
  0xcd   : > { %s919_s0 = scalar_lea.hbm %s918_s7, 4  ;;  %p924_p11 = scmp.lt.s32.totalorder %s918_s7, %s1273_s3 }
  0xce   : > { %p920_p2 = scmp.ne.s32.totalorder %s918_s7, %s919_s0  ;;  %p925_p1 = scmp.lt.s32.totalorder %s923_s12, %s919_s0 }
  0xd0   : > { %p921_p4 = pnand %p920_p2, %p1127_p0  ;;  %p926_p3 = por %p925_p1, %p924_p11 }
  0xd2   : > { %p922_p7 = pneg %p921_p4 }
  0xd4   : > { %p927_p8 = pnand %p926_p3, %p922_p7 }
  0xd6   : > { %930 = shalt.err (!%p927_p8)
}
  0xd7   : > { %s1295_s16 = smov %s1294_s6  ;;  %s1296_s15 = sld [smem:[#allocation16_spill]]  ;;  %v391_v34 = vpop.f32.mrf.mxu1  ;;  %v411_v35 = vpack.c.bf16 %v403_v32, %v403_v32 }
  0xd8   : > { %s1298_s1 = scalar_lea.vmem [#allocation11], %s1162_s28  ;;  %s945_s8 = sshra.s32 %s470_s11, 4  ;;  %s946_s8 = int_to_ptr.hbm [resolvable:$true] %s945_s8 }
  0xd9   : > { %412 = vst [vmem:[%s1298_s1] sm:$0xf] %v411_v35  ;;  %s947_s9 = scalar_lea.hbm %s946_s8, 4  ;;  %s951_s7 = scalar_lea.hbm %s1275_s5, 8 }
  0xda   : > { %p948_p9 = scmp.ne.s32.totalorder %s946_s8, %s947_s9  ;;  %p952_p13 = scmp.lt.s32.totalorder %s946_s8, %s1275_s5 }
  0xdb   : > { %p953_p2 = scmp.lt.s32.totalorder %s951_s7, %s947_s9 }
  0xdc   : > { %p949_p10 = pnand %p948_p9, %p1127_p0 }
  0xdd   : > { %s1297_s21 = int_to_ptr.vmem [resolvable:$true] %s1296_s15  ;;  %p954_p4 = por %p953_p2, %p952_p13 }
  0xde   : > { %700 = dma.vmem_to_hbm [thread:$0]  (%p1127_p0), %s1297_s21, 64, %s1295_s16, %s414_s29  }
  0xdf   : > { %p950_p12 = pneg %p949_p10 }
  0xe1   : > { %p955_p7 = pnand %p954_p4, %p950_p12 }
  0xe3   : > { %958 = shalt.err (!%p955_p7)
}
  0xe4   : > { %702 = dma.vmem_to_hbm [thread:$0]  (%p1127_p0), %s468_s10, 64, %s470_s11, %s1198_s24   ;;  %v404_v36 = vpop.f32.mrf.mxu2 }
  0xe5 PF: > { %s481_s28 = sand.u32 1, %s1001_s18   ;;  %p718_p11 = pnand %p639_p6, %p1136_p5 }
  0xe6   : > { %s482_s29 = scalar_lea.sflag [#allocation4], %s481_s28 }
  0xe7   : > { %p719_p1 = pneg %p718_p11 }
  0xe9   : > { %992 = dma.done.wait (%p719_p1), %s482_s29, 64  }
  0xea   : > { %994 = vsyncadd (%p719_p1), %s482_s29, 4294967232  ;;  %s1299_s14 = sadd.s32 4294967294, %s1021_s23  }
  0xeb   : > { %s491_s12 = sand.u32 1, %s1299_s14  }
  0xec   : > { %s492_s16 = scalar_lea.sflag [#allocation10], %s491_s12 }
  0xed   : > { %996 = dma.done.wait (%p719_p1), %s492_s16, 128  }
  0xee   : > { %998 = vsyncadd (%p719_p1), %s492_s16, 4294967168  ;;  %s26_s23 = sadd.s32 1, %s1021_s23   ;;  %s1300_s18 = smov %s1005_s19 }
  0xef   : > { %p23_p0 = scmp.ge.s32.totalorder %s26_s23, 4   ;;  %s1301_s19 = smov %s1009_s20 }
  0xf0   : > { %s1302_s20 = smov %s1134_s26  ;;  %s1303_s21 = smov %s1017_s22 }
  0xf1   : > { %s1304_s22 = smov %s1306_s13  ;;  %25 = sbr.rel (!%p23_p0) target bundleno = 12 (0xc), region = 117 }
  0xf6   :  { %508 = vsyncpa [#allocation3], 1 }
  0xf7   :  { %510 = vsyncpa [#allocation3 + $0x1], 1 }
  0xf8   :  { %511 = vsyncpa [#allocation6], 1 }
  0xf9   :  { %512 = vsyncpa [#allocation4], 1 }
  0xfa   :  { %514 = vsyncpa [#allocation4 + $0x1], 1 }
  0xfb   :  { %515 = vsyncpa [#allocation10], 1 }
  0xfc   :  { %517 = vsyncpa [#allocation10 + $0x1], 1 }

</bundles_post_ra>
